<compile_context>
chip_gen: v6e
topology: v6e:2x2x1
jax: 0.10.0
libtpu: 0.0.40
codegen_flags: <defaults>
</compile_context>

<pallas_src>
import functools

import jax
import jax.numpy as jnp
from jax.experimental import pallas as pl
from jax.experimental.pallas import tpu as pltpu

LANE = 128        # vreg lane width -> lane-dense feature padding
NODE_ALIGN = 16   # bf16 sublane tile -> tile-aligned prefix slices


def _round_up(n, m):
    return (n + m - 1) // m * m


def _pad2(a, rows, cols, dtype):
    out = jnp.zeros((rows, cols), dtype)
    return out.at[: a.shape[0], : a.shape[1]].set(a.astype(dtype))


def _fused_sage_kernel(x_ref, a0_ref, a1_ref, a2_ref,
                       w0_ref, w1_ref, w2_ref,
                       b0_ref, b1_ref, b2_ref,
                       out_ref, h1_ref, h2_ref, *, p1, p2, p3):
    """Three fused SAGEConv('mean') layers, ReLU between layers, all resident in VMEM.

    x_ref        : (P0, Fp)  bf16  padded input node features (src of layer 0)
    a{i}_ref     : (P_{i+1}, P_i) bf16  row-normalized dense adjacency of block i
    w{i}_ref     : (2*Fp, Fp) bf16  [W_self ; W_neigh] stacked on the contraction axis
    b{i}_ref     : (1, Fp)   f32   bias
    out_ref      : (P3, Fp)  f32   final layer output
    h1/h2_ref    : VMEM scratch for the two intermediate feature maps (bf16)
    """

    def layer(a, h_src, n_dst_pad, w_ref, b_ref, relu):
        # mean neighbor aggregation: bf16 inputs, f32 accumulation on the MXU.
        agg = jnp.dot(a, h_src, preferred_element_type=jnp.float32)
        # merged self/neigh projection: [h_dst | agg] @ [W_self ; W_neigh]
        cat = jnp.concatenate(
            [h_src[:n_dst_pad, :], agg.astype(jnp.bfloat16)], axis=-1)
        out = jnp.dot(cat, w_ref[...], preferred_element_type=jnp.float32) + b_ref[...]
        if relu:
            out = jnp.maximum(out, 0.0)
        return out

    x = x_ref[...]
    h1_ref[...] = layer(a0_ref[...], x, p1, w0_ref, b0_ref, True).astype(jnp.bfloat16)
    h1 = h1_ref[...]
    h2_ref[...] = layer(a1_ref[...], h1, p2, w1_ref, b1_ref, True).astype(jnp.bfloat16)
    h2 = h2_ref[...]
    out_ref[...] = layer(a2_ref[...], h2, p3, w2_ref, b2_ref, False).astype(out_ref.dtype)


def sage_forward(blocks, x, params):
    """Mirror of SAGE.forward: 3 SAGEConv('mean') layers, ReLU after all but the last."""
    assert len(blocks) == 3 and len(params) == 3
    n_nodes = [blocks[0].shape[1]] + [b.shape[0] for b in blocks]  # [N0, N1, N2, N3]
    p = [_round_up(n, NODE_ALIGN) for n in n_nodes]

    f_in = x.shape[1]
    f_out = params[-1][0].shape[1]
    fp = _round_up(max(f_in, max(w.shape[1] for w, _, _ in params)), LANE)

    # Lane/sublane-padded, bf16 streamed inputs.
    x_p = _pad2(x, p[0], fp, jnp.bfloat16)
    a_p = [_pad2(blocks[i], p[i + 1], p[i], jnp.bfloat16) for i in range(3)]

    w_cat, b_p = [], []
    for (w_self, w_neigh, bias) in params:
        wc = jnp.zeros((2 * fp, fp), jnp.bfloat16)
        wc = wc.at[: w_self.shape[0], : w_self.shape[1]].set(w_self.astype(jnp.bfloat16))
        wc = wc.at[fp: fp + w_neigh.shape[0], : w_neigh.shape[1]].set(
            w_neigh.astype(jnp.bfloat16))
        w_cat.append(wc)
        b_p.append(_pad2(bias.reshape(1, -1), 1, fp, jnp.float32))

    # Advisory cost model for the XLA scheduler.
    flops = 0
    for i in range(3):
        flops += 2 * p[i + 1] * p[i] * fp          # A @ H
        flops += 2 * p[i + 1] * (2 * fp) * fp      # [h_dst | agg] @ W_cat
    bytes_accessed = (p[0] * fp * 2
                      + sum(p[i + 1] * p[i] * 2 for i in range(3))
                      + 3 * (2 * fp) * fp * 2 + 3 * fp * 4
                      + p[3] * fp * 4)

    vmem = pl.BlockSpec(memory_space=pltpu.MemorySpace.VMEM)
    kern = functools.partial(_fused_sage_kernel, p1=p[1], p2=p[2], p3=p[3])

    out_p = pl.pallas_call(
        kern,
        out_shape=jax.ShapeDtypeStruct((p[3], fp), jnp.float32),
        in_specs=[vmem] * 10,
        out_specs=vmem,
        scratch_shapes=[pltpu.VMEM((p[1], fp), jnp.bfloat16),
                        pltpu.VMEM((p[2], fp), jnp.bfloat16)],
        compiler_params=pltpu.CompilerParams(vmem_limit_bytes=32 * 1024 * 1024),
        cost_estimate=pl.CostEstimate(flops=flops, transcendentals=0,
                                      bytes_accessed=bytes_accessed),
    )(x_p, a_p[0], a_p[1], a_p[2], w_cat[0], w_cat[1], w_cat[2],
      b_p[0], b_p[1], b_p[2])

    return out_p[: n_nodes[3], : f_out]


def sage_reference(blocks, x, params):
    """Pure-JAX f32 reference of SAGE.forward (DGL SAGEConv 'mean' semantics)."""
    h = x
    for i, (a, (w_self, w_neigh, bias)) in enumerate(zip(blocks, params)):
        n_dst = a.shape[0]
        out = h[:n_dst] @ w_self + (a @ h) @ w_neigh + bias
        if i < len(params) - 1:
            out = jax.nn.relu(out)
        h = out
    return h


def _make_block(key, n_dst, n_src):
    """Dense random bipartite block, row-normalized ('mean' aggregator)."""
    adj = (jax.random.uniform(key, (n_dst, n_src)) < 0.3).astype(jnp.float32)
    adj = adj.at[jnp.arange(n_dst), jnp.arange(n_dst)].set(1.0)  # ensure >=1 in-edge
    deg = jnp.maximum(adj.sum(axis=1, keepdims=True), 1.0)
    return adj / deg


def _init_layer(key, f_in, f_out):
    k1, k2 = jax.random.split(key, 2)
    scale = 1.0 / jnp.sqrt(jnp.float32(f_in))
    w_self = jax.random.uniform(k1, (f_in, f_out), jnp.float32, -scale, scale)
    w_neigh = jax.random.uniform(k2, (f_in, f_out), jnp.float32, -scale, scale)
    bias = jnp.zeros((1, f_out), jnp.float32)
    return w_self, w_neigh, bias


if __name__ == "__main__":
    key = jax.random.PRNGKey(0)
    in_size, hidden_size = 16, 32

    # 3-hop sampled subgraph node counts (src of layer i = dst of layer i-1).
    n_nodes = [64, 32, 16, 8]

    k_x, k_b0, k_b1, k_b2, k_l0, k_l1, k_l2 = jax.random.split(key, 7)
    x = jax.random.normal(k_x, (n_nodes[0], in_size), jnp.float32)
    blocks = [_make_block(k_b0, n_nodes[1], n_nodes[0]),
              _make_block(k_b1, n_nodes[2], n_nodes[1]),
              _make_block(k_b2, n_nodes[3], n_nodes[2])]
    params = [_init_layer(k_l0, in_size, hidden_size),
              _init_layer(k_l1, hidden_size, hidden_size),
              _init_layer(k_l2, hidden_size, hidden_size)]

    out = jax.block_until_ready(sage_forward(blocks, x, params))
    ref = sage_reference(blocks, x, params)

    assert out.shape == (n_nodes[3], hidden_size), out.shape
    assert bool(jnp.all(jnp.isfinite(out)))
    max_err = float(jnp.max(jnp.abs(out - ref)))
    assert max_err < 5e-2 * (1.0 + float(jnp.max(jnp.abs(ref)))), max_err
    print("KERNEL_OK")
</pallas_src>

<mosaic_0001>
module attributes {stable_mosaic.version = 11 : i64} {
  func.func @_fused_sage_kernel(%arg0: memref<64x128xbf16, #tpu.memory_space<vmem>>, %arg1: memref<32x64xbf16, #tpu.memory_space<vmem>>, %arg2: memref<16x32xbf16, #tpu.memory_space<vmem>>, %arg3: memref<16x16xbf16, #tpu.memory_space<vmem>>, %arg4: memref<256x128xbf16, #tpu.memory_space<vmem>>, %arg5: memref<256x128xbf16, #tpu.memory_space<vmem>>, %arg6: memref<256x128xbf16, #tpu.memory_space<vmem>>, %arg7: memref<1x128xf32, #tpu.memory_space<vmem>>, %arg8: memref<1x128xf32, #tpu.memory_space<vmem>>, %arg9: memref<1x128xf32, #tpu.memory_space<vmem>>, %arg10: memref<16x128xf32, #tpu.memory_space<vmem>>, %arg11: memref<32x128xbf16, #tpu.memory_space<vmem>>, %arg12: memref<16x128xbf16, #tpu.memory_space<vmem>>) attributes {dimension_semantics = [], scalar_prefetch = 0 : i64, scratch_operands = 2 : i64, tpu.core_type = #tpu.core_type<tc>} {
    %c0 = arith.constant 0 : index
    %c0_0 = arith.constant 0 : index
    %0 = vector.load %arg0[%c0, %c0_0] : memref<64x128xbf16, #tpu.memory_space<vmem>>, vector<64x128xbf16>
    %c0_1 = arith.constant 0 : index
    %c0_2 = arith.constant 0 : index
    %1 = vector.load %arg1[%c0_1, %c0_2] : memref<32x64xbf16, #tpu.memory_space<vmem>>, vector<32x64xbf16>
    %cst = arith.constant dense<0.000000e+00> : vector<32x128xf32>
    %2 = tpu.matmul %1, %0, %cst {dimension_numbers = #tpu.dot_dimension_numbers<[1], [0], [0], [1], [0, 0, 1, 1], [], []>} : vector<32x64xbf16>, vector<64x128xbf16>, vector<32x128xf32> -> vector<32x128xf32>
    %3 = vector.extract_strided_slice %0 {offsets = [0, 0], sizes = [32, 128], strides = [1, 1]} : vector<64x128xbf16> to vector<32x128xbf16>
    %4 = arith.truncf %2 : vector<32x128xf32> to vector<32x128xbf16>
    %5 = tpu.concatenate %3, %4 in 1 : vector<32x128xbf16>, vector<32x128xbf16> -> vector<32x256xbf16>
    %c0_3 = arith.constant 0 : index
    %c0_4 = arith.constant 0 : index
    %6 = vector.load %arg4[%c0_3, %c0_4] : memref<256x128xbf16, #tpu.memory_space<vmem>>, vector<256x128xbf16>
    %cst_5 = arith.constant dense<0.000000e+00> : vector<32x128xf32>
    %7 = tpu.matmul %5, %6, %cst_5 {dimension_numbers = #tpu.dot_dimension_numbers<[1], [0], [0], [1], [0, 0, 1, 1], [], []>} : vector<32x256xbf16>, vector<256x128xbf16>, vector<32x128xf32> -> vector<32x128xf32>
    %c0_6 = arith.constant 0 : index
    %c0_7 = arith.constant 0 : index
    %8 = vector.load %arg7[%c0_6, %c0_7] : memref<1x128xf32, #tpu.memory_space<vmem>>, vector<1x128xf32>
    %9 = vector.broadcast %8 : vector<1x128xf32> to vector<32x128xf32>
    %10 = arith.addf %7, %9 : vector<32x128xf32>
    %cst_8 = arith.constant 0.000000e+00 : f32
    %11 = vector.broadcast %cst_8 : f32 to vector<32x128xf32>
    %12 = arith.maximumf %10, %11 : vector<32x128xf32>
    %13 = arith.truncf %12 : vector<32x128xf32> to vector<32x128xbf16>
    %c0_9 = arith.constant 0 : index
    %c0_10 = arith.constant 0 : index
    %14 = vector.load %arg11[%c0_9, %c0_10] : memref<32x128xbf16, #tpu.memory_space<vmem>>, vector<32x128xbf16>
    tpu.vector_store %arg11[%c0_9, %c0_10], %13 {strides = array<i32>} : memref<32x128xbf16, #tpu.memory_space<vmem>>, vector<32x128xbf16>,
    %c0_11 = arith.constant 0 : index
    %c0_12 = arith.constant 0 : index
    %15 = vector.load %arg11[%c0_11, %c0_12] : memref<32x128xbf16, #tpu.memory_space<vmem>>, vector<32x128xbf16>
    %c0_13 = arith.constant 0 : index
    %c0_14 = arith.constant 0 : index
    %16 = vector.load %arg2[%c0_13, %c0_14] : memref<16x32xbf16, #tpu.memory_space<vmem>>, vector<16x32xbf16>
    %cst_15 = arith.constant dense<0.000000e+00> : vector<16x128xf32>
    %17 = tpu.matmul %16, %15, %cst_15 {dimension_numbers = #tpu.dot_dimension_numbers<[1], [0], [0], [1], [0, 0, 1, 1], [], []>} : vector<16x32xbf16>, vector<32x128xbf16>, vector<16x128xf32> -> vector<16x128xf32>
    %18 = vector.extract_strided_slice %15 {offsets = [0, 0], sizes = [16, 128], strides = [1, 1]} : vector<32x128xbf16> to vector<16x128xbf16>
    %19 = arith.truncf %17 : vector<16x128xf32> to vector<16x128xbf16>
    %20 = tpu.concatenate %18, %19 in 1 : vector<16x128xbf16>, vector<16x128xbf16> -> vector<16x256xbf16>
    %c0_16 = arith.constant 0 : index
    %c0_17 = arith.constant 0 : index
    %21 = vector.load %arg5[%c0_16, %c0_17] : memref<256x128xbf16, #tpu.memory_space<vmem>>, vector<256x128xbf16>
    %cst_18 = arith.constant dense<0.000000e+00> : vector<16x128xf32>
    %22 = tpu.matmul %20, %21, %cst_18 {dimension_numbers = #tpu.dot_dimension_numbers<[1], [0], [0], [1], [0, 0, 1, 1], [], []>} : vector<16x256xbf16>, vector<256x128xbf16>, vector<16x128xf32> -> vector<16x128xf32>
    %c0_19 = arith.constant 0 : index
    %c0_20 = arith.constant 0 : index
    %23 = vector.load %arg8[%c0_19, %c0_20] : memref<1x128xf32, #tpu.memory_space<vmem>>, vector<1x128xf32>
    %24 = vector.broadcast %23 : vector<1x128xf32> to vector<16x128xf32>
    %25 = arith.addf %22, %24 : vector<16x128xf32>
    %cst_21 = arith.constant 0.000000e+00 : f32
    %26 = vector.broadcast %cst_21 : f32 to vector<16x128xf32>
    %27 = arith.maximumf %25, %26 : vector<16x128xf32>
    %28 = arith.truncf %27 : vector<16x128xf32> to vector<16x128xbf16>
    %c0_22 = arith.constant 0 : index
    %c0_23 = arith.constant 0 : index
    %29 = vector.load %arg12[%c0_22, %c0_23] : memref<16x128xbf16, #tpu.memory_space<vmem>>, vector<16x128xbf16>
    tpu.vector_store %arg12[%c0_22, %c0_23], %28 {strides = array<i32>} : memref<16x128xbf16, #tpu.memory_space<vmem>>, vector<16x128xbf16>,
    %c0_24 = arith.constant 0 : index
    %c0_25 = arith.constant 0 : index
    %30 = vector.load %arg12[%c0_24, %c0_25] : memref<16x128xbf16, #tpu.memory_space<vmem>>, vector<16x128xbf16>
    %c0_26 = arith.constant 0 : index
    %c0_27 = arith.constant 0 : index
    %31 = vector.load %arg3[%c0_26, %c0_27] : memref<16x16xbf16, #tpu.memory_space<vmem>>, vector<16x16xbf16>
    %cst_28 = arith.constant dense<0.000000e+00> : vector<16x128xf32>
    %32 = tpu.matmul %31, %30, %cst_28 {dimension_numbers = #tpu.dot_dimension_numbers<[1], [0], [0], [1], [0, 0, 1, 1], [], []>} : vector<16x16xbf16>, vector<16x128xbf16>, vector<16x128xf32> -> vector<16x128xf32>
    %33 = arith.truncf %32 : vector<16x128xf32> to vector<16x128xbf16>
    %34 = tpu.concatenate %30, %33 in 1 : vector<16x128xbf16>, vector<16x128xbf16> -> vector<16x256xbf16>
    %c0_29 = arith.constant 0 : index
    %c0_30 = arith.constant 0 : index
    %35 = vector.load %arg6[%c0_29, %c0_30] : memref<256x128xbf16, #tpu.memory_space<vmem>>, vector<256x128xbf16>
    %cst_31 = arith.constant dense<0.000000e+00> : vector<16x128xf32>
    %36 = tpu.matmul %34, %35, %cst_31 {dimension_numbers = #tpu.dot_dimension_numbers<[1], [0], [0], [1], [0, 0, 1, 1], [], []>} : vector<16x256xbf16>, vector<256x128xbf16>, vector<16x128xf32> -> vector<16x128xf32>
    %c0_32 = arith.constant 0 : index
    %c0_33 = arith.constant 0 : index
    %37 = vector.load %arg9[%c0_32, %c0_33] : memref<1x128xf32, #tpu.memory_space<vmem>>, vector<1x128xf32>
    %38 = vector.broadcast %37 : vector<1x128xf32> to vector<16x128xf32>
    %39 = arith.addf %36, %38 : vector<16x128xf32>
    %c0_34 = arith.constant 0 : index
    %c0_35 = arith.constant 0 : index
    %40 = vector.load %arg10[%c0_34, %c0_35] : memref<16x128xf32, #tpu.memory_space<vmem>>, vector<16x128xf32>
    tpu.vector_store %arg10[%c0_34, %c0_35], %39 {strides = array<i32>} : memref<16x128xf32, #tpu.memory_space<vmem>>, vector<16x128xf32>,
    return
  }
}

</mosaic_0001>

<bundles_post_ra>
// kernel: tpu_custom_call.1
= control target key start
LH: loop header
LB: loop body
LE: loop exit
PB: predicated region body
PF: predicated region fallthrough
CT: control target
= control target key end

     0   :  { %15 = vsyncpa [#allocation5], 0  ;;  %s1538_s0 = inlined_call_operand.hbm [shape: bf16[64,128], index: 0, kind: input, shape index: {}]   ;;  %s1539_s1 = inlined_call_operand.hbm [shape: bf16[32,64], index: 1, kind: input, shape index: {}]   ;;  %s1540_s2 = inlined_call_operand.hbm [shape: bf16[16,32], index: 2, kind: input, shape index: {}]   ;;  %s1541_s3 = inlined_call_operand.hbm [shape: bf16[16,16], index: 3, kind: input, shape index: {}]   ;;  %s1542_s4 = inlined_call_operand.hbm [shape: bf16[256,128], index: 4, kind: input, shape index: {}]   ;;  %s1543_s5 = inlined_call_operand.hbm [shape: bf16[256,128], index: 5, kind: input, shape index: {}]   ;;  %s1544_s6 = inlined_call_operand.hbm [shape: bf16[256,128], index: 6, kind: input, shape index: {}]   ;;  %s1545_s7 = inlined_call_operand.vmem [shape: f32[1,128], index: 7, kind: input, shape index: {}]   ;;  %s1546_s8 = inlined_call_operand.vmem [shape: f32[1,128], index: 8, kind: input, shape index: {}]   ;;  %s1547_s9 = inlined_call_operand.vmem [shape: f32[1,128], index: 9, kind: input, shape index: {}]   ;;  %s1548_s10 = inlined_call_operand.hbm [shape: f32[16,128], index: 10, kind: output, shape index: {}]  }
   0x1   :  { %16 = vsyncpa [#allocation8], 0 }
   0x2   :  { %17 = vsyncpa [#allocation11], 0 }
   0x3   :  { %18 = vsyncpa [#allocation14], 0 }
   0x4   :  { %19 = vsyncpa [#allocation6], 0  ;;  %s1406_s13 = smov [#allocation7]   ;;  %s1407_s15 = smov [#allocation10]  }
   0x5   :  { %s37_s14 = sshll.u32 %s1406_s13, 4  ;;  %s61_s16 = sshll.u32 %s1407_s15, 4  ;;  %s38_s14 = int_to_ptr.vmem [resolvable:$true] %s37_s14  ;;  %s62_s16 = int_to_ptr.vmem [resolvable:$true] %s61_s16 }
   0x6   :  { %s1244_s17 = scalar_lea.vmem %s38_s14, 256  ;;  %p1249_p1 = scmp.lt.s32.totalorder %s38_s14, %s38_s14 }
   0x7   :  { %p1245_p0 = scmp.ne.s32.totalorder %s38_s14, %s1244_s17  ;;  %p1250_p2 = scmp.lt.s32.totalorder %s1244_s17, %s1244_s17 }
   0x9   :  { %p1251_p3 = por %p1250_p2, %p1249_p1 }
   0xb   :  { %p1252_p4 = pnand %p1251_p3, %p1245_p0 }
   0xd   :  { %1255 = shalt.err (!%p1252_p4)
}
   0xe   :  { %s1408_s18 = smov 64   ;;  %s1409_s19 = smov 4  }
   0xf   :  { %43 = dma.hbm_to_vmem [thread:$0]  %s1539_s1, 256, %s38_s14, [#allocation8], %s1408_s18, %s1408_s18, %s1409_s19  }
  0x10   :  { %s1264_s22 = scalar_lea.vmem %s62_s16, 128  ;;  %p1269_p6 = scmp.lt.s32.totalorder %s62_s16, %s62_s16 }
  0x11   :  { %p1265_p5 = scmp.ne.s32.totalorder %s62_s16, %s1264_s22  ;;  %p1270_p7 = scmp.lt.s32.totalorder %s1264_s22, %s1264_s22 }
  0x13   :  { %p1271_p8 = por %p1270_p7, %p1269_p6 }
  0x15   :  { %p1272_p9 = pnand %p1271_p8, %p1265_p5 }
  0x17   :  { %1275 = shalt.err (!%p1272_p9)
}
  0x18   :  { %67 = dma.hbm_to_vmem [thread:$0]  %s1541_s3, 128, %s62_s16, [#allocation11], %s1408_s18, %s1408_s18, %s1409_s19  }
  0x19   :  { %s1410_s25 = smov [#allocation13]   ;;  %s1411_s27 = smov [#allocation4]  }
  0x1a   :  { %s85_s26 = sshll.u32 %s1410_s25, 4  ;;  %s25_s28 = sshll.u32 %s1411_s27, 4  ;;  %s86_s26 = int_to_ptr.vmem [resolvable:$true] %s85_s26  ;;  %s26_s28 = int_to_ptr.vmem [resolvable:$true] %s25_s28 }
  0x1b   :  { %s1284_s1 = scalar_lea.vmem %s86_s26, 2048  ;;  %p1289_p11 = scmp.lt.s32.totalorder %s86_s26, %s86_s26 }
  0x1c   :  { %p1285_p10 = scmp.ne.s32.totalorder %s86_s26, %s1284_s1  ;;  %p1290_p12 = scmp.lt.s32.totalorder %s1284_s1, %s1284_s1 }
  0x1e   :  { %p1291_p13 = por %p1290_p12, %p1289_p11 }
  0x20   :  { %p1292_p0 = pnand %p1291_p13, %p1285_p10 }
  0x22   :  { %1295 = shalt.err (!%p1292_p0)
}
  0x23   :  { %91 = dma.hbm_to_vmem [thread:$0]  %s1543_s5, 2048, %s86_s26, [#allocation14], %s1408_s18, %s1408_s18, %s1409_s19  }
  0x24   :  { %s1304_s3 = scalar_lea.vmem %s26_s28, 512  ;;  %p1309_p2 = scmp.lt.s32.totalorder %s26_s28, %s26_s28 }
  0x25   :  { %p1305_p1 = scmp.ne.s32.totalorder %s26_s28, %s1304_s3  ;;  %p1310_p3 = scmp.lt.s32.totalorder %s1304_s3, %s1304_s3 }
  0x27   :  { %p1311_p4 = por %p1310_p3, %p1309_p2 }
  0x29   :  { %p1312_p5 = pnand %p1311_p4, %p1305_p1 }
  0x2b   :  { %1315 = shalt.err (!%p1312_p5)
}
  0x2c   :  { %31 = dma.hbm_to_vmem [thread:$0]  %s1538_s0, 512, %s26_s28, [#allocation5], %s1408_s18, %s1408_s18, %s1409_s19  }
  0x2d   :  { %s1412_s13 = smov [#allocation9]   ;;  %s1413_s15 = smov [#allocation12]  }
  0x2e   :  { %s49_s14 = sshll.u32 %s1412_s13, 4  ;;  %s73_s16 = sshll.u32 %s1413_s15, 4  ;;  %s50_s14 = int_to_ptr.vmem [resolvable:$true] %s49_s14  ;;  %s74_s16 = int_to_ptr.vmem [resolvable:$true] %s73_s16 }
  0x2f   :  { %s1324_s5 = scalar_lea.vmem %s50_s14, 128  ;;  %p1329_p7 = scmp.lt.s32.totalorder %s50_s14, %s50_s14 }
  0x30   :  { %p1325_p6 = scmp.ne.s32.totalorder %s50_s14, %s1324_s5  ;;  %p1330_p8 = scmp.lt.s32.totalorder %s1324_s5, %s1324_s5 }
  0x32   :  { %p1331_p9 = por %p1330_p8, %p1329_p7 }
  0x34   :  { %p1332_p10 = pnand %p1331_p9, %p1325_p6 }
  0x36   :  { %1335 = shalt.err (!%p1332_p10)
}
  0x37   :  { %55 = dma.hbm_to_vmem [thread:$0]  %s1540_s2, 128, %s50_s14, [#allocation8], %s1408_s18, %s1408_s18, %s1409_s19  }
  0x38   :  { %s1344_s0 = scalar_lea.vmem %s74_s16, 2048  ;;  %p1349_p12 = scmp.lt.s32.totalorder %s74_s16, %s74_s16 }
  0x39   :  { %p1345_p11 = scmp.ne.s32.totalorder %s74_s16, %s1344_s0  ;;  %p1350_p13 = scmp.lt.s32.totalorder %s1344_s0, %s1344_s0 }
  0x3b   :  { %p1351_p0 = por %p1350_p13, %p1349_p12 }
  0x3d   :  { %p1352_p1 = pnand %p1351_p0, %p1345_p11 }
  0x3f   :  { %1355 = shalt.err (!%p1352_p1)
}
  0x40   :  { %79 = dma.hbm_to_vmem [thread:$0]  %s1542_s4, 2048, %s74_s16, [#allocation11], %s1408_s18, %s1408_s18, %s1409_s19  }
  0x41   :  { %s1414_s23 = smov [#allocation15]  }
  0x42   :  { %s97_s24 = sshll.u32 %s1414_s23, 4  ;;  %s98_s24 = int_to_ptr.vmem [resolvable:$true] %s97_s24 }
  0x43   :  { %s1364_s25 = scalar_lea.vmem %s98_s24, 2048  ;;  %p1369_p3 = scmp.lt.s32.totalorder %s98_s24, %s98_s24 }
  0x44   :  { %p1365_p2 = scmp.ne.s32.totalorder %s98_s24, %s1364_s25  ;;  %p1370_p4 = scmp.lt.s32.totalorder %s1364_s25, %s1364_s25 }
  0x46   :  { %p1371_p5 = por %p1370_p4, %p1369_p3 }
  0x48   :  { %p1372_p6 = pnand %p1371_p5, %p1365_p2 }
  0x4a   :  { %1375 = shalt.err (!%p1372_p6)
}
  0x4b   :  { %103 = dma.hbm_to_vmem [thread:$0]  %s1544_s6, 2048, %s98_s24, [#allocation14], %s1408_s18, %s1408_s18, %s1409_s19  }
  0x4c   :  { %1396 = dma.done.wait [#allocation5], 512  }
  0x4d   :  { %1397 = vsyncadd [#allocation5], 4294966784 }
  0x4e   :  { %1398 = dma.done.wait [#allocation8], 384  }
  0x4f   :  { %1399 = vsyncadd [#allocation8], 4294966912 }
  0x50   :  { %1400 = dma.done.wait [#allocation11], 2176  }
  0x51   :  { %1401 = vsyncadd [#allocation11], 4294965120 }
  0x52   :  { %1402 = dma.done.wait [#allocation14], 4096  }
  0x53   :  { %1403 = vsyncadd [#allocation14], 4294963200  ;;  %v1177_v0 = vld [vmem:[#allocation4 + $0x18] sm:$0xff]   ;;  %v1178_v1 = vld [vmem:[#allocation4 + $0x10] sm:$0xff]   ;;  %vm178_vm0 = vcmask 523264   ;;  %v1415_v28 = vmov 0.0  }
  0x54   :  { %1137 = vmatprep.subr.bf16.mxu0 %v1177_v0  ;;  %v1179_v2 = vld [vmem:[#allocation4 + $0x8] sm:$0xff]   ;;  %v1181_v3 = vld [vmem:[#allocation7] sm:$0xff]   ;;  %v1183_v5 = vld [vmem:[#allocation12 + $0x78] sm:$0xff]   ;;  %vm1416_vm1 = vmmov 0   ;;  %vm467_vm2 = vcmask 261120   ;;  %vm716_vm3 = vcmask 130048  }
  0x55   :  { %1138 = vmatpush3.bf16.msra.mxu0 %v1177_v0  ;;  %v1180_v4 = vld [vmem:[#allocation4] sm:$0xff]   ;;  %1145 = vmatprep.mubr.msk.bf16.mxu0 %vm178_vm0, %v1181_v3  ;;  %v1184_v6 = vld [vmem:[#allocation12 + $0x38] sm:$0xff]   ;;  %v1185_v7 = vld [vmem:[#allocation12 + $0x70] sm:$0xff]   ;;  %s1417_s27 = smov [#allocation16]  }
  0x56   :  { %1139 = vmatprep.subr.bf16.mxu0 %v1178_v1  ;;  %1060 = vmatprep.subr.bf16.mxu1 %v1183_v5  ;;  %v1186_v8 = vld [vmem:[#allocation12 + $0x30] sm:$0xff]   ;;  %v1187_v9 = vld [vmem:[#allocation12 + $0x68] sm:$0xff]   ;;  %v1189_v12 = vld [vmem:[#allocation12 + $0x60] sm:$0xff]   ;;  %s945_s28 = sshll.u32 %s1417_s27, 4  ;;  %s946_s28 = int_to_ptr.vmem [resolvable:$true] %s945_s28 }
  0x57   :  { %1061 = vmatpush3.bf16.msra.mxu1 %v1184_v6  ;;  %v1182_v10 = vld [vmem:[#allocation7 + $0x8] sm:$0xff]   ;;  %v1190_v13 = vld [vmem:[#allocation12 + $0x20] sm:$0xff]   ;;  %v1191_v14 = vld [vmem:[#allocation12 + $0x58] sm:$0xff]   ;;  %s1376_s1 = scalar_lea.vmem %s946_s28, 256  ;;  %p1381_p8 = scmp.lt.s32.totalorder %s946_s28, %s946_s28 }
  0x58   :  { %1062 = vmatprep.subr.bf16.mxu1 %v1185_v7  ;;  %v1188_v11 = vld [vmem:[#allocation12 + $0x28] sm:$0xff]   ;;  %v1192_v15 = vld [vmem:[#allocation12 + $0x18] sm:$0xff]   ;;  %v1193_v16 = vld [vmem:[#allocation12 + $0x50] sm:$0xff]   ;;  %p1377_p7 = scmp.ne.s32.totalorder %s946_s28, %s1376_s1  ;;  %p1382_p9 = scmp.lt.s32.totalorder %s1376_s1, %s1376_s1 }
  0x59   :  { %1140 = vmatpush3.bf16.msra.mxu0 %v1178_v1  ;;  %v1194_v17 = vld [vmem:[#allocation12 + $0x10] sm:$0xff]   ;;  %v1195_v18 = vld [vmem:[#allocation12 + $0x48] sm:$0xff]   ;;  %v1197_v20 = vld [vmem:[#allocation12 + $0x40] sm:$0xff]  }
  0x5a   :  { %1141 = vmatprep.subr.bf16.mxu0 %v1179_v2  ;;  %v1196_v19 = vld [vmem:[#allocation12 + $0x8] sm:$0xff]   ;;  %v1198_v21 = vld [vmem:[#allocation12] sm:$0xff]   ;;  %v1202_v53 = vld [vmem:[#allocation13 + $0x78] sm:$0xff]   ;;  %p1383_p10 = por %p1382_p9, %p1381_p8 }
  0x5b   :  { %1063 = vmatpush3.bf16.msra.mxu1 %v1186_v8  ;;  %v968_v32 = vld [vmem:[%s1545_s7] ss:$0 sm:$0xff]  ;;  %v1201_v55 = vld [vmem:[#allocation9] sm:$0xff]   ;;  %v1203_v56 = vld [vmem:[#allocation13 + $0x38] sm:$0xff]  }
  0x5c   :  { %1064 = vmatprep.subr.bf16.mxu1 %v1187_v9  ;;  %v1204_v57 = vld [vmem:[#allocation13 + $0x70] sm:$0xff]   ;;  %v1206_v59 = vld [vmem:[#allocation13 + $0x68] sm:$0xff]   ;;  %v1208_v61 = vld [vmem:[#allocation13 + $0x60] sm:$0xff]   ;;  %p1384_p11 = pnand %p1383_p10, %p1377_p7 }
  0x5d   :  { %1142 = vmatpush3.bf16.msra.mxu0 %v1179_v2  ;;  %v1205_v58 = vld [vmem:[#allocation13 + $0x30] sm:$0xff]   ;;  %v1207_v60 = vld [vmem:[#allocation13 + $0x28] sm:$0xff]   ;;  %v1209_v62 = vld [vmem:[#allocation13 + $0x20] sm:$0xff]  }
  0x5e   :  { %1143 = vmatprep.subr.bf16.mxu0 %v1180_v4  ;;  %v1210_v63 = vld [vmem:[#allocation13 + $0x58] sm:$0xff]   ;;  %v1212_v1 = vld [vmem:[#allocation13 + $0x50] sm:$0xff]   ;;  %v1214_v3 = vld [vmem:[#allocation13 + $0x48] sm:$0xff]  }
  0x5f   :  { %1065 = vmatpush3.bf16.msra.mxu1 %v1188_v11  ;;  %v1211_v0 = vld [vmem:[#allocation13 + $0x18] sm:$0xff]   ;;  %v1216_v5 = vld [vmem:[#allocation13 + $0x40] sm:$0xff]  }
  0x60   :  { %1066 = vmatprep.subr.bf16.mxu1 %v1189_v12  ;;  %v1217_v6 = vld [vmem:[#allocation13] sm:$0xff]   ;;  %v1220_v12 = vld [vmem:[#allocation15 + $0x78] sm:$0xff]  }
  0x61   :  { %1144 = vmatpush3.bf16.msra.mxu0 %v1180_v4 }
  0x62   :  { %1149 = vmatprep.subr.bf16.mxu0 %v1415_v28 }
  0x63   :  { %1067 = vmatpush3.bf16.msra.mxu1 %v1190_v13  ;;  %v1221_v13 = vld [vmem:[#allocation15 + $0x38] sm:$0xff]  }
  0x64   :  { %1146 = vmatmul.mubr.msk.bf16.vlgmr.msra.gmra.mxu0 %vm178_vm0, %v1182_v10  ;;  %1068 = vmatprep.subr.bf16.mxu1 %v1191_v14  ;;  %v1222_v14 = vld [vmem:[#allocation15 + $0x70] sm:$0xff]  }
  0x65   :  { %1153 = vmatprep.mubr.msk.bf16.mxu0 %vm1416_vm1, %v1415_v28 }
  0x67   :  { %1069 = vmatpush3.bf16.msra.mxu1 %v1192_v15  ;;  %v1223_v15 = vld [vmem:[#allocation15 + $0x30] sm:$0xff]  }
  0x68   :  { %1070 = vmatprep.subr.bf16.mxu1 %v1193_v16  ;;  %v1224_v16 = vld [vmem:[#allocation15 + $0x68] sm:$0xff]  }
  0x6b   :  { %1071 = vmatpush3.bf16.msra.mxu1 %v1194_v17  ;;  %v1225_v17 = vld [vmem:[#allocation15 + $0x28] sm:$0xff]  }
  0x6c   :  { %1072 = vmatprep.subr.bf16.mxu1 %v1195_v18  ;;  %v1226_v18 = vld [vmem:[#allocation15 + $0x60] sm:$0xff]  }
  0x6f   :  { %1073 = vmatpush3.bf16.msra.mxu1 %v1196_v19  ;;  %v1227_v19 = vld [vmem:[#allocation15 + $0x20] sm:$0xff]  }
  0x70   :  { %1074 = vmatprep.subr.bf16.mxu1 %v1197_v20  ;;  %v1228_v20 = vld [vmem:[#allocation15 + $0x58] sm:$0xff]  }
  0x73   :  { %1075 = vmatpush3.bf16.msra.mxu1 %v1198_v21  ;;  %v1229_v21 = vld [vmem:[#allocation15 + $0x18] sm:$0xff]  }
  0x74   :  { %1115 = vmatprep.subr.bf16.mxu1 %v1220_v12 }
 0x124   :  { %v1147_v22 = vpop.f32.mrf.mxu0 }
 0x126   :  { %v219_v23 = vpop.f32.mrf.mxu0 }
 0x128   :  { %v1148_v24 = vpop.f32.mrf.mxu0 }
 0x129   :  { %v235_v27 = vpack.c.bf16 %v1148_v24, %v1147_v22  ;;  %v1230_v22 = vld [vmem:[#allocation15 + $0x50] sm:$0xff]  }
 0x12a   :  { %v222_v25 = vpop.f32.mrf.mxu0 }
 0x12b   :  { %v234_v26 = vpack.c.bf16 %v222_v25, %v219_v23  ;;  %v1231_v23 = vld [vmem:[#allocation15 + $0x10] sm:$0xff]  }
 0x12d   :  { %403 = vmatprep.mubr.bf16.mxu1 %v234_v26 }
 0x12e   :  { %404 = vmatmul.mubr.bf16.vlgmr.msra.gmra.mxu1 %v1180_v4  ;;  %v1215_v4 = vld [vmem:[#allocation13 + $0x8] sm:$0xff]  }
 0x12f   :  { %411 = vmatprep.mubr.bf16.mxu1 %v235_v27  ;;  %1116 = vmatpush3.bf16.msra.mxu1 %v1221_v13  ;;  %v993_v27 = vld [vmem:[%s1546_s8] ss:$0 sm:$0xff] }
 0x130   :  { %1117 = vmatprep.subr.bf16.mxu1 %v1222_v14 }
 0x133   :  { %1118 = vmatpush3.bf16.msra.mxu1 %v1223_v15 }
 0x134   :  { %1119 = vmatprep.subr.bf16.mxu1 %v1224_v16 }
 0x136   :  { %412 = vmatmul.mubr.bf16.gmra.mxu1 %v1179_v2  ;;  %v1213_v2 = vld [vmem:[#allocation13 + $0x10] sm:$0xff]  }
 0x137   :  { %1120 = vmatpush3.bf16.msra.mxu1 %v1225_v17 }
 0x138   :  { %1121 = vmatprep.subr.bf16.mxu1 %v1226_v18 }
 0x13b   :  { %1122 = vmatpush3.bf16.msra.mxu1 %v1227_v19 }
 0x13c   :  { %1123 = vmatprep.subr.bf16.mxu1 %v1228_v20 }
 0x13f   :  { %1124 = vmatpush3.bf16.msra.mxu1 %v1229_v21 }
 0x140   :  { %1125 = vmatprep.subr.bf16.mxu1 %v1230_v22 }
 0x143   :  { %1126 = vmatpush3.bf16.msra.mxu1 %v1231_v23 }
 0x1ee   :  { %v1076_v29 = vpop.f32.mrf.mxu1 }
 0x1f0   :  { %v1077_v30 = vpop.f32.mrf.mxu1 }
 0x1f1   :  { %v1078_v31 = vadd.f32 %v1077_v30, %v1076_v29 }
 0x1f2   :  { %v1079_v33 = vpop.f32.mrf.mxu1 }
 0x1f3   :  { %v406_v35 = vadd.f32 %v1078_v31, %v968_v32 }
 0x1f4   :  { %v1080_v34 = vpop.f32.mrf.mxu1 }
 0x1f5   :  { %v1081_v36 = vadd.f32 %v1080_v34, %v1079_v33  ;;  %v420_v40 = vmax.f32 %v406_v35, 0.0 }
 0x1f6   :  { %v1082_v37 = vpop.f32.mrf.mxu1 }
 0x1f7   :  { %v409_v38 = vadd.f32 %v1081_v36, %v968_v32 }
 0x1f8   :  { %v1083_v39 = vpop.f32.mrf.mxu1 }
 0x1f9   :  { %v421_v41 = vmax.f32 %v409_v38, 0.0  ;;  %v1084_v42 = vadd.f32 %v1083_v39, %v1082_v37  ;;  %v1219_v37 = vld [vmem:[#allocation10] sm:$0xff]   ;;  %v1232_v38 = vld [vmem:[#allocation15 + $0x48] sm:$0xff]  }
 0x1fa   :  { %v1085_v43 = vpop.f32.mrf.mxu1  ;;  %v1233_v39 = vld [vmem:[#allocation15 + $0x8] sm:$0xff]   ;;  %1127 = vmatprep.subr.bf16.mxu1 %v1232_v38 }
 0x1fb   :  { %v1041_v44 = vpack.c.bf16 %v421_v41, %v420_v40  ;;  %v414_v46 = vadd.f32 %v1084_v42, %v968_v32  ;;  %1128 = vmatpush3.bf16.msra.mxu1 %v1233_v39  ;;  %v1234_v40 = vld [vmem:[#allocation15 + $0x40] sm:$0xff]  }
 0x1fc   :  { %v1086_v45 = vpop.f32.mrf.mxu1  ;;  %v1235_v41 = vld [vmem:[#allocation15] sm:$0xff]   ;;  %1129 = vmatprep.subr.bf16.mxu1 %v1234_v40 }
 0x1fd   :  { %1042 = vst [vmem:[#allocation2] sm:$0xff] %v1041_v44   ;;  %v1087_v47 = vadd.f32 %v1086_v45, %v1085_v43  ;;  %v422_v49 = vmax.f32 %v414_v46, 0.0 }
 0x1ff   :  { %v417_v48 = vadd.f32 %v1087_v47, %v968_v32  ;;  %1130 = vmatpush3.bf16.msra.mxu1 %v1235_v41 }
 0x201   :  { %v423_v50 = vmax.f32 %v417_v48, 0.0  ;;  %v1015_v48 = vld [vmem:[%s1547_s9] ss:$0 sm:$0xff] }
 0x203   :  { %v1046_v51 = vpack.c.bf16 %v423_v50, %v422_v49 }
 0x204   :  { %v1200_v54 = vld [vmem:[#allocation2] sm:$0xff]  }
 0x205   :  { %1053 = vst [vmem:[#allocation2 + $0x8] sm:$0xff] %v1046_v51  }
 0x20c   :  { %v1199_v52 = vld [vmem:[#allocation2 + $0x8] sm:$0xff]  }
 0x20d   :  { %1150 = vmatpush3.bf16.msra.mxu0 %v1199_v52 }
 0x20e   :  { %1151 = vmatprep.subr.bf16.mxu0 %v1415_v28 }
 0x211   :  { %1152 = vmatpush3.bf16.msra.mxu0 %v1200_v54 }
 0x212   :  { %1091 = vmatprep.subr.bf16.mxu0 %v1202_v53 }
 0x214   :  { %1154 = vmatmul.mubr.msk.bf16.vlgmr.msra.gmra.mxu0 %vm467_vm2, %v1201_v55 }
 0x215   :  { %1092 = vmatpush3.bf16.msra.mxu0 %v1203_v56 }
 0x216   :  { %1093 = vmatprep.subr.bf16.mxu0 %v1204_v57 }
 0x219   :  { %1094 = vmatpush3.bf16.msra.mxu0 %v1205_v58 }
 0x21a   :  { %1095 = vmatprep.subr.bf16.mxu0 %v1206_v59 }
 0x21d   :  { %1096 = vmatpush3.bf16.msra.mxu0 %v1207_v60 }
 0x21e   :  { %1097 = vmatprep.subr.bf16.mxu0 %v1208_v61 }
 0x221   :  { %1098 = vmatpush3.bf16.msra.mxu0 %v1209_v62 }
 0x222   :  { %1099 = vmatprep.subr.bf16.mxu0 %v1210_v63 }
 0x225   :  { %1100 = vmatpush3.bf16.msra.mxu0 %v1211_v0 }
 0x226   :  { %1101 = vmatprep.subr.bf16.mxu0 %v1212_v1 }
 0x229   :  { %1102 = vmatpush3.bf16.msra.mxu0 %v1213_v2 }
 0x22a   :  { %1103 = vmatprep.subr.bf16.mxu0 %v1214_v3 }
 0x22d   :  { %1104 = vmatpush3.bf16.msra.mxu0 %v1215_v4 }
 0x22e   :  { %1105 = vmatprep.subr.bf16.mxu0 %v1216_v5 }
 0x231   :  { %1106 = vmatpush3.bf16.msra.mxu0 %v1217_v6 }
 0x232   :  { %1157 = vmatprep.subr.bf16.mxu0 %v1415_v28 }
 0x2d4   :  { %v505_v7 = vpop.f32.mrf.mxu0 }
 0x2d6   :  { %v1155_v8 = vpop.f32.mrf.mxu0 }
 0x2d8   :  { %v508_v9 = vpop.f32.mrf.mxu0 }
 0x2d9   :  { %v512_v10 = vpack.c.bf16 %v508_v9, %v505_v7 }
 0x2da   :  { %v1156_v11 = vpop.f32.mrf.mxu0 }
 0x2db   :  { %680 = vmatprep.mubr.bf16.mxu0 %v512_v10 }
 0x2dc   :  { %681 = vmatmul.mubr.bf16.vlgmr.msra.gmra.mxu0 %v1200_v54 }
 0x2dd   :  { %1159 = vmatprep.mubr.msk.bf16.mxu0 %vm1416_vm1, %v1415_v28 }
 0x39c   :  { %v1107_v24 = vpop.f32.mrf.mxu0 }
 0x39e   :  { %v1108_v25 = vpop.f32.mrf.mxu0 }
 0x39f   :  { %v1109_v26 = vadd.f32 %v1108_v25, %v1107_v24 }
 0x3a0   :  { %v1110_v28 = vpop.f32.mrf.mxu0 }
 0x3a1   :  { %v683_v30 = vadd.f32 %v1109_v26, %v993_v27 }
 0x3a2   :  { %v1111_v29 = vpop.f32.mrf.mxu0 }
 0x3a3   :  { %v1112_v31 = vadd.f32 %v1111_v29, %v1110_v28  ;;  %v689_v33 = vmax.f32 %v683_v30, 0.0 }
 0x3a5   :  { %v686_v32 = vadd.f32 %v1112_v31, %v993_v27 }
 0x3a7   :  { %v690_v34 = vmax.f32 %v686_v32, 0.0 }
 0x3a9   :  { %v1051_v35 = vpack.c.bf16 %v690_v34, %v689_v33 }
 0x3ab   :  { %1052 = vst [vmem:[#allocation3] sm:$0xff] %v1051_v35  }
 0x3b2   :  { %v1218_v36 = vld [vmem:[#allocation3] sm:$0xff]  }
 0x3b3   :  { %1158 = vmatpush3.bf16.msra.mxu0 %v1218_v36 }
 0x3b6   :  { %1160 = vmatmul.mubr.msk.bf16.vlgmr.msra.gmra.mxu0 %vm716_vm3, %v1219_v37 }
 0x476   :  { %v754_v42 = vpop.f32.mrf.mxu0 }
 0x478   :  { %v1161_v43 = vpop.f32.mrf.mxu0 }
 0x47a   :  { %v757_v44 = vpop.f32.mrf.mxu0 }
 0x47b   :  { %v761_v45 = vpack.c.bf16 %v757_v44, %v754_v42 }
 0x47c   :  { %v1162_v46 = vpop.f32.mrf.mxu0 }
 0x47d   :  { %929 = vmatprep.mubr.bf16.mxu1 %v761_v45 }
 0x47e   :  { %930 = vmatmul.mubr.bf16.vlgmr.msra.gmra.mxu1 %v1218_v36 }
 0x53e   :  { %v1131_v47 = vpop.f32.mrf.mxu1 }
 0x540   :  { %v1132_v49 = vpop.f32.mrf.mxu1 }
 0x541   :  { %v1133_v50 = vadd.f32 %v1132_v49, %v1131_v47 }
 0x542   :  { %v1134_v51 = vpop.f32.mrf.mxu1 }
 0x543   :  { %v932_v52 = vadd.f32 %v1133_v50, %v1015_v48 }
 0x544   :  { %v1135_v53 = vpop.f32.mrf.mxu1 }
 0x545   :  { %938 = vst [vmem:[#allocation16] sm:$0xff] %v932_v52  ;;  %v1136_v54 = vadd.f32 %v1135_v53, %v1134_v51 }
 0x547   :  { %v935_v55 = vadd.f32 %v1136_v54, %v1015_v48 }
 0x549   :  { %939 = vst [vmem:[#allocation16 + $0x8] sm:$0xff] %v935_v55 }
 0x54a   :  { %1387 = shalt.err (!%p1384_p11)
}
 0x54b   :  { %s1418_s9 = smov 128   ;;  %s1419_s29 = smov 8  }
 0x54c   :  { %951 = dma.vmem_to_hbm [thread:$0]  %s946_s28, 256, %s1548_s10, [#allocation6], %s1418_s9, %s1418_s9, %s1419_s29  }
 0x54d   :  { %1404 = dma.done.wait [#allocation6], 256  }
 0x54e   :  { %1405 = vsyncadd [#allocation6], 4294967040 }
 0x54f   :  { %955 = vsyncpa [#allocation5], 1 }
 0x550   :  { %956 = vsyncpa [#allocation8], 1 }
 0x551   :  { %957 = vsyncpa [#allocation11], 1 }
 0x552   :  { %958 = vsyncpa [#allocation14], 1 }
 0x553   :  { %959 = vsyncpa [#allocation6], 1 }

</bundles_post_ra>
